<compile_context>
chip_gen: v7x
topology: tpu7x:2x2x1
jax: 0.10.0
libtpu: 0.0.40
codegen_flags: <defaults>
</compile_context>

<pallas_src>
import math
from functools import partial

import jax
import jax.numpy as jnp
from jax.experimental import pallas as pl
from jax.experimental.pallas import tpu as pltpu

_SUBLANE = 8
_MAX_ROW_TILE = 1024          # rows per grid step (multiple of 8)
_VMEM_BUDGET = 8 << 20        # rough per-call double-buffer budget (bytes)


def _round_up(n, m):
    return ((n + m - 1) // m) * m


def _choose_row_tile(n_rows, d, extra_bytes=0):
    """Largest row tile (multiple of 8, <= _MAX_ROW_TILE) whose double-buffered
    input+output tiles (plus broadcast params) fit the VMEM budget, without
    exceeding the 8-row-padded problem size."""
    n8 = _round_up(max(n_rows, 1), _SUBLANE)
    tile = _round_up(min(_MAX_ROW_TILE, n8), _SUBLANE)
    while tile > _SUBLANE and 2 * tile * (d + 1) * 4 + extra_bytes > _VMEM_BUDGET:
        tile = _round_up(tile // 2, _SUBLANE)
    return tile


def _pad_rows(x_flat, tile):
    n = x_flat.shape[0]
    npad = _round_up(n, tile)
    return jnp.pad(x_flat, (0, npad - n)), npad


def _compiler_params(working_set_bytes):
    # Explicit scoped-VMEM limit: >= default, comfortably under v7x's 64 MiB.
    vmem = int(min(max(working_set_bytes + (2 << 20), 16 << 20), 48 << 20))
    return pltpu.CompilerParams(
        dimension_semantics=("parallel",),
        vmem_limit_bytes=vmem,
    )


# --------------------------------------------------------------------------
# BinnedEmbedding:  tanh((x[..., None] - bias) * 2**weight)
# --------------------------------------------------------------------------
def _binned_kernel(x_ref, coef_ref, b_ref, o_ref):
    x = x_ref[...]                                   # (T, 1)
    o_ref[...] = jnp.tanh((x - b_ref[...]) * coef_ref[...])


def binned_embedding(x, weight, bias):
    # x: (B, S) ; weight: (1, d) ; bias: (d,)
    orig_shape = x.shape
    d = weight.shape[1]
    coef = jnp.exp2(weight.astype(jnp.float32))      # hoisted off the grid loop
    xf = x.reshape(-1).astype(jnp.float32)
    tile = _choose_row_tile(xf.shape[0], d)
    xp, npad = _pad_rows(xf, tile)
    ws = 2 * tile * (d + 1) * 4 + 2 * 2 * d * 4
    out = pl.pallas_call(
        _binned_kernel,
        out_shape=jax.ShapeDtypeStruct((npad, d), jnp.float32),
        grid=(npad // tile,),
        in_specs=[
            pl.BlockSpec((tile, 1), lambda i: (i, 0)),
            pl.BlockSpec((1, d), lambda i: (0, 0)),
            pl.BlockSpec((1, d), lambda i: (0, 0)),
        ],
        out_specs=pl.BlockSpec((tile, d), lambda i: (i, 0)),
        compiler_params=_compiler_params(ws),
    )(xp[:, None], coef, bias[None, :].astype(jnp.float32))
    return out[: xf.shape[0]].reshape(*orig_shape, d)


# --------------------------------------------------------------------------
# PeriodicEmbedding:  cat([sin(x*f[::2]), cos(x*f[1::2])], -1), f = sigmoid(W)
# --------------------------------------------------------------------------
def _periodic_kernel(x_ref, fs_ref, fc_ref, o_ref, *, ds):
    x = x_ref[...]                                   # (T, 1)
    o_ref[:, :ds] = jnp.sin(x * fs_ref[...])         # write halves directly,
    o_ref[:, ds:] = jnp.cos(x * fc_ref[...])         # no concatenate/relayout


def periodic_embedding(x, weight):
    # x: (B, S) ; weight: (1, d)
    orig_shape = x.shape
    d = weight.shape[1]
    # parameter prep (glue): sigmoid + strided slicing of the (1, d) weight
    freq = jax.nn.sigmoid(weight.astype(jnp.float32))
    fs = freq[:, ::2]
    fc = freq[:, 1::2]
    ds, dc = fs.shape[1], fc.shape[1]
    xf = x.reshape(-1).astype(jnp.float32)
    tile = _choose_row_tile(xf.shape[0], ds + dc)
    xp, npad = _pad_rows(xf, tile)
    ws = 2 * tile * (ds + dc + 1) * 4 + 2 * (ds + dc) * 4
    out = pl.pallas_call(
        partial(_periodic_kernel, ds=ds),
        out_shape=jax.ShapeDtypeStruct((npad, ds + dc), jnp.float32),
        grid=(npad // tile,),
        in_specs=[
            pl.BlockSpec((tile, 1), lambda i: (i, 0)),
            pl.BlockSpec((1, ds), lambda i: (0, 0)),
            pl.BlockSpec((1, dc), lambda i: (0, 0)),
        ],
        out_specs=pl.BlockSpec((tile, ds + dc), lambda i: (i, 0)),
        compiler_params=_compiler_params(ws),
    )(xp[:, None], fs, fc)
    return out[: xf.shape[0]].reshape(*orig_shape, ds + dc)


# --------------------------------------------------------------------------
# DiceEmbedding (affine=False):  polar(theta) @ Q
#   theta = clip(((x-b)*w - min) / (max - min), 0, 1) * pi
#   polar = sin(theta)**sin_powers * cos(theta)**cos_powers  (* r)
# --------------------------------------------------------------------------
def _dice_kernel(x_ref, sp_ref, cp_ref, q_ref, o_ref, *,
                 min_bound, max_bound, r, aff_w, aff_b):
    x = (x_ref[...] - aff_b) * aff_w                 # affine folded in-kernel
    theta = jnp.clip((x - min_bound) / (max_bound - min_bound), 0.0, 1.0) * jnp.pi
    s = jnp.maximum(jnp.sin(theta), 0.0)             # mathematically >= 0; clamp
    c = jnp.cos(theta)                               #   float32-pi residue
    # sin**p as exp(p * log(sin)): log only on the (T, 1) column (EUP work ~ T,
    # not T*d), guarded for s == 0 (power(0, 0) == 1 convention).
    log_s = jnp.log(jnp.maximum(s, 1e-30))
    sp = sp_ref[...]                                 # (1, d) int-valued f32
    pw = jnp.exp(sp * log_s)                         # (T, d)
    pw = jnp.where(s > 0.0, pw, jnp.where(sp == 0.0, 1.0, 0.0))
    cp = cp_ref[...]                                 # (1, d), only 0 or 1
    polar = (pw * jnp.where(cp == 0.0, 1.0, c)) * r  # select, not pow (cos < 0 ok)
    # TODO(synk): cast polar/Q to bf16 here for the native bf16 MXU path on
    # v6e/v7x once downstream tolerance allows; kept f32 for parity with the
    # (float64) torch reference.
    o_ref[...] = jnp.dot(polar, q_ref[...], preferred_element_type=jnp.float32)


def dice_embedding(x, sin_powers, cos_powers, Q, *, min_bound, max_bound, r,
                   aff_weight=1.0, aff_bias=0.0):
    # x: (B, S) ; Q: (d, d)
    orig_shape = x.shape
    d = Q.shape[0]
    xf = x.reshape(-1).astype(jnp.float32)
    q_bytes = 2 * d * d * 4                          # Q is double-buffered
    tile = _choose_row_tile(xf.shape[0], d, extra_bytes=q_bytes)
    xp, npad = _pad_rows(xf, tile)
    ws = 2 * tile * (d + 1) * 4 + q_bytes + 2 * 2 * d * 4
    kernel = partial(_dice_kernel, min_bound=float(min_bound),
                     max_bound=float(max_bound), r=float(r),
                     aff_w=float(aff_weight), aff_b=float(aff_bias))
    out = pl.pallas_call(
        kernel,
        out_shape=jax.ShapeDtypeStruct((npad, d), jnp.float32),
        grid=(npad // tile,),
        in_specs=[
            pl.BlockSpec((tile, 1), lambda i: (i, 0)),
            pl.BlockSpec((1, d), lambda i: (0, 0)),
            pl.BlockSpec((1, d), lambda i: (0, 0)),
            pl.BlockSpec((d, d), lambda i: (0, 0)),
        ],
        out_specs=pl.BlockSpec((tile, d), lambda i: (i, 0)),
        compiler_params=_compiler_params(ws),
    )(xp[:, None], sin_powers, cos_powers, Q.astype(jnp.float32))
    return out[: xf.shape[0]].reshape(*orig_shape, d)


# --------------------------------------------------------------------------
# NumericEmbedding wrapper (dispatch on config, deterministic synthetic init)
# --------------------------------------------------------------------------
class NumericEmbeddingPallas:
    def __init__(self, config, key):
        d = config["d_model"]
        kind = config["num_emb"].lower()
        self.kind = kind
        self.d_model = d
        if kind == "binned":
            self.weight = jax.random.normal(key, (1, d), jnp.float32) * 0.02
            self.bias = jnp.linspace(0.0, 2100.0, d, dtype=jnp.float32)
        elif kind == "periodic":
            self.weight = jax.random.normal(key, (1, d), jnp.float32)
        elif kind == "dice":
            # NumericEmbedding uses DiceEmbedding(min_bound=1, max_bound=2, affine=False)
            # TODO(synk): Q is a deterministic synthetic orthogonal matrix (jax PRNG),
            # not bit-identical to torch.manual_seed(0) randn + QR (float64).
            M = jax.random.normal(key, (d, d), jnp.float32)
            Q, _ = jnp.linalg.qr(M, mode="complete")
            self.Q = Q
            sp = jnp.arange(0, d, dtype=jnp.float32)
            sp = sp.at[-2].set(d - 1).at[-1].set(d - 2)
            cp = jnp.ones((d,), jnp.float32).at[-2].set(0.0)
            self.sin_powers = sp[None, :]
            self.cos_powers = cp[None, :]
            self.min_bound, self.max_bound, self.r = 1.0, 2.0, 1.0
            self.aff_weight = 1.0   # affine=False -> fixed 1
            self.aff_bias = 0.0     # affine=False -> fixed 0
        else:
            raise ValueError(f"Unknown numerical embedding type {kind}")

    def __call__(self, x):
        if self.kind == "binned":
            return binned_embedding(x, self.weight, self.bias)
        if self.kind == "periodic":
            return periodic_embedding(x, self.weight)
        return dice_embedding(x, self.sin_powers, self.cos_powers, self.Q,
                              min_bound=self.min_bound, max_bound=self.max_bound,
                              r=self.r, aff_weight=self.aff_weight,
                              aff_bias=self.aff_bias)


# --------------------------------------------------------------------------
# Pure-JAX references for verification
# --------------------------------------------------------------------------
def _ref_binned(x, w, b):
    return jnp.tanh((x[..., None] - b) * jnp.exp2(w[0]))


def _ref_periodic(x, w):
    f = jax.nn.sigmoid(w)
    return jnp.concatenate(
        [jnp.sin(x[..., None] * f[0, ::2]), jnp.cos(x[..., None] * f[0, 1::2])], -1)


def _ref_dice(x, mod):
    t = jnp.clip((x - mod.min_bound) / (mod.max_bound - mod.min_bound), 0, 1) * jnp.pi
    s = jnp.maximum(jnp.sin(t), 0.0)[..., None]      # sin(theta) >= 0 in exact math
    c = jnp.cos(t)[..., None]
    polar = jnp.power(s, mod.sin_powers[0]) * jnp.where(mod.cos_powers[0] == 0, 1.0, c)
    return (polar * mod.r) @ mod.Q


if __name__ == "__main__":
    B, S, d_model = 2, 8, 32
    key = jax.random.PRNGKey(0)
    kx, kb, kp, kd = jax.random.split(key, 4)

    ok = True

    # binned: values in roughly [0, 2100]
    x_b = jax.random.uniform(kx, (B, S), jnp.float32, 0.0, 2100.0)
    mod = NumericEmbeddingPallas({"num_emb": "binned", "d_model": d_model}, kb)
    out = jax.block_until_ready(mod(x_b))
    ok &= bool(jnp.allclose(out, _ref_binned(x_b, mod.weight, mod.bias), atol=1e-5))
    assert out.shape == (B, S, d_model)

    # periodic
    x_p = jax.random.normal(kx, (B, S), jnp.float32) * 10.0
    mod = NumericEmbeddingPallas({"num_emb": "periodic", "d_model": d_model}, kp)
    out = jax.block_until_ready(mod(x_p))
    ok &= bool(jnp.allclose(out, _ref_periodic(x_p, mod.weight), atol=1e-5))
    assert out.shape == (B, S, d_model)

    # dice: values around [1, 2] (some clip to the bounds)
    x_d = jax.random.uniform(kx, (B, S), jnp.float32, 0.8, 2.2)
    mod = NumericEmbeddingPallas({"num_emb": "dice", "d_model": d_model}, kd)
    out = jax.block_until_ready(mod(x_d))
    ok &= bool(jnp.allclose(out, _ref_dice(x_d, mod), atol=1e-4))
    assert out.shape == (B, S, d_model)

    if ok:
        print("KERNEL_OK")
    else:
        print("MISMATCH")
</pallas_src>

<mosaic_0001>
module attributes {stable_mosaic.version = 11 : i64} {
  func.func @_binned_kernel(%arg0: i32, %arg1: memref<16x1xf32, #tpu.memory_space<vmem>>, %arg2: memref<1x32xf32, #tpu.memory_space<vmem>>, %arg3: memref<1x32xf32, #tpu.memory_space<vmem>>, %arg4: memref<16x32xf32, #tpu.memory_space<vmem>>) attributes {dimension_semantics = [#tpu.dimension_semantics<parallel>], iteration_bounds = array<i64: 1>, scalar_prefetch = 0 : i64, scratch_operands = 0 : i64, tpu.core_type = #tpu.core_type<tc>, window_params = [{transform_indices = @transform_0, window_bounds = array<i64: 16, 1>}, {pipeline_mode = #tpu.pipeline_mode<synchronous>, transform_indices = @transform_1, window_bounds = array<i64: 1, 32>}, {pipeline_mode = #tpu.pipeline_mode<synchronous>, transform_indices = @transform_2, window_bounds = array<i64: 1, 32>}, {transform_indices = @transform_3, window_bounds = array<i64: 16, 32>}]} {
    %c0 = arith.constant 0 : index
    %c0_0 = arith.constant 0 : index
    %0 = vector.load %arg1[%c0, %c0_0] : memref<16x1xf32, #tpu.memory_space<vmem>>, vector<16x1xf32>
    %c0_1 = arith.constant 0 : index
    %c0_2 = arith.constant 0 : index
    %1 = vector.load %arg3[%c0_1, %c0_2] : memref<1x32xf32, #tpu.memory_space<vmem>>, vector<1x32xf32>
    %2 = vector.broadcast %0 : vector<16x1xf32> to vector<16x32xf32>
    %3 = vector.broadcast %1 : vector<1x32xf32> to vector<16x32xf32>
    %4 = arith.subf %2, %3 : vector<16x32xf32>
    %c0_3 = arith.constant 0 : index
    %c0_4 = arith.constant 0 : index
    %5 = vector.load %arg2[%c0_3, %c0_4] : memref<1x32xf32, #tpu.memory_space<vmem>>, vector<1x32xf32>
    %6 = vector.broadcast %5 : vector<1x32xf32> to vector<16x32xf32>
    %7 = arith.mulf %4, %6 : vector<16x32xf32>
    %8 = math.tanh %7 : vector<16x32xf32>
    %c0_5 = arith.constant 0 : index
    %c0_6 = arith.constant 0 : index
    %9 = vector.load %arg4[%c0_5, %c0_6] : memref<16x32xf32, #tpu.memory_space<vmem>>, vector<16x32xf32>
    tpu.vector_store %arg4[%c0_5, %c0_6], %8 {strides = array<i32>} : memref<16x32xf32, #tpu.memory_space<vmem>>, vector<16x32xf32>,
    return
  }
  func.func @transform_0(%arg0: i32) -> (i32, i32) {
    %c0_i32 = arith.constant 0 : i32
    %c0_i32_0 = arith.constant 0 : i32
    return %arg0, %c0_i32 : i32, i32
  }
  func.func @transform_1(%arg0: i32) -> (i32, i32) {
    %c0_i32 = arith.constant 0 : i32
    %c0_i32_0 = arith.constant 0 : i32
    %c0_i32_1 = arith.constant 0 : i32
    return %c0_i32, %c0_i32_0 : i32, i32
  }
  func.func @transform_2(%arg0: i32) -> (i32, i32) {
    %c0_i32 = arith.constant 0 : i32
    %c0_i32_0 = arith.constant 0 : i32
    %c0_i32_1 = arith.constant 0 : i32
    return %c0_i32, %c0_i32_0 : i32, i32
  }
  func.func @transform_3(%arg0: i32) -> (i32, i32) {
    %c0_i32 = arith.constant 0 : i32
    %c0_i32_0 = arith.constant 0 : i32
    return %arg0, %c0_i32 : i32, i32
  }
}

</mosaic_0001>

<bundles_post_ra>
// kernel: tpu_custom_call.1
= control target key start
LH: loop header
LB: loop body
LE: loop exit
PB: predicated region body
PF: predicated region fallthrough
CT: control target
= control target key end

     0   :  { %v101_v1 = vmov 0   ;;  %s149_s0 = inlined_call_operand.vmem [shape: f32[16,1], index: 0, kind: input, shape index: {}]   ;;  %s150_s1 = inlined_call_operand.vmem [shape: f32[1,32], index: 1, kind: input, shape index: {}]   ;;  %s151_s2 = inlined_call_operand.vmem [shape: f32[1,32], index: 2, kind: input, shape index: {}]   ;;  %s152_s3 = inlined_call_operand.hbm [shape: f32[16,32], index: 3, kind: output, shape index: {}]  }
   0x1   :  { %v15_v0 = vld [vmem:[%s149_s0] sm:$0xff]  ;;  %72 = vset.pattern.permute.xlu0 %v101_v1 }
   0x2   :  { %8 = vsyncpa [#allocation3], 0  ;;  %20 = vperm.xlu0 %72, %v15_v0   ;;  %v16_v2 = vld [vmem:[%s149_s0 + $0x8] sm:$0xff]  ;;  %v66_v3 = vld [vmem:[%s151_s2] ss:$0 sm:$0xff]  ;;  %vm47_vm0 = vcmask 261120  }
   0x3   :  { %v67_v4 = vld [vmem:[%s150_s1] ss:$0 sm:$0xff]  ;;  %s102_s20 = smov [#allocation2]  }
   0x4   :  { %s55_s0 = sshll.u32 %s102_s20, 4  ;;  %s56_s0 = int_to_ptr.vmem [resolvable:$true] %s55_s0 }
   0x5   :  { %s77_s2 = scalar_lea.vmem %s56_s0, 256  ;;  %p82_p1 = scmp.lt.s32.totalorder %s56_s0, %s56_s0 }
   0x6   :  { %25 = vperm.xlu0 %72, %v16_v2   ;;  %p78_p0 = scmp.ne.s32.totalorder %s56_s0, %s77_s2  ;;  %p83_p2 = scmp.lt.s32.totalorder %s77_s2, %s77_s2 }
   0x8   :  { %p84_p3 = por %p83_p2, %p82_p1 }
   0xa   :  { %p85_p4 = pnand %p84_p3, %p78_p0 }
  0x81   :  { %v21_v5 = vpop.permute.xlu0 %20 }
  0x82   :  { %v34_v6 = vsub.f32 %v21_v5, %v66_v3 }
  0x84   :  { %v43_v7 = vmul.f32 %v67_v4, %v34_v6 }
  0x85   :  { %v26_v8 = vpop.permute.xlu0 %25 }
  0x86   :  { %73 = vtanh.f32 %v43_v7  ;;  %v35_v9 = vsub.f32 %v26_v8, %v66_v3 }
  0x88   :  { %v44_v10 = vmul.f32 %v67_v4, %v35_v9 }
  0x8a   :  { %75 = vtanh.f32 %v44_v10 }
  0x90   :  { %v74_v11 = vpop.eup %73 }
  0x91   :  { %48 = vst.msk [vmem:[#allocation2] sm:$0xff] %vm47_vm0, %v74_v11 }
  0x94   :  { %v76_v12 = vpop.eup %75 }
  0x95   :  { %49 = vst.msk [vmem:[#allocation2 + $0x8] sm:$0xff] %vm47_vm0, %v76_v12 }
  0x96   :  { %88 = shalt.err (!%p85_p4)
}
  0x97   :  { %s89_s22 = scalar_lea.hbm %s152_s3, 256 }
  0x98   :  { %p90_p5 = scmp.ne.s32.totalorder %s152_s3, %s89_s22  ;;  %p93_p6 = scmp.lt.u32.totalorder %s89_s22, %s152_s3 }
  0x9a   :  { %p95_p7 = pnand %p93_p6, %p90_p5 }
  0x9c   :  { %98 = shalt.err (!%p95_p7)
}
  0x9d   :  { %s103_s27 = smov 128   ;;  %s104_s28 = smov 8  }
  0x9e   :  { %61 = dma.vmem_to_hbm [thread:$0]  %s56_s0, 256, %s152_s3, [#allocation3], %s103_s27, %s103_s27, %s104_s28  }
  0x9f   :  { %99 = dma.done.wait [#allocation3], 256  }
  0xa0   :  { %100 = vsyncadd [#allocation3], 4294967040 }
  0xa1   :  { %65 = vsyncpa [#allocation3], 1 }

</bundles_post_ra>
